<compile_context>
chip_gen: v7x
topology: tpu7x:2x2x1
jax: 0.10.0
libtpu: 0.0.40
codegen_flags: <defaults>
</compile_context>

<pallas_src>
import functools

import jax
import jax.numpy as jnp
from jax.experimental import pallas as pl
from jax.experimental.pallas import tpu as pltpu


def _round_up(x, m):
    return ((x + m - 1) // m) * m


def _cdiv(a, b):
    return (a + b - 1) // b


def _choose_batch_tile(batch, block_b):
    """Pick (tb, b_pad): even split of B into ceil(B/block_b) blocks, rounded
    up to the 8-row sublane granule, with >=2 blocks once B is big enough that
    each block still amortizes the ~0.35us per-grid-step overhead (v7x has two
    TensorCores on the single 'parallel' axis)."""
    nblocks = _cdiv(batch, block_b)
    if nblocks < 2 and batch >= 1024:
        nblocks = 2
    tb = _round_up(_cdiv(batch, nblocks), 8)
    b_pad = _round_up(batch, tb)
    return tb, b_pad


def gaussian_model_kernel(state_ref, action_ref,
                          w1s_ref, w1a_ref, b1_ref,
                          w2_ref, b2_ref,
                          w3_ref, b3_ref,
                          out_ref, *, state_dim):
    # Inputs may stream in as bf16; promote once, all math stays f32.
    x_s = state_ref[...].astype(jnp.float32)
    x_a = action_ref[...].astype(jnp.float32)

    # Layer 1 (concat-free): relu(state @ W1[:sd] + action @ W1[sd:] + b1).
    # NOTE: kept as two K<=32 dots; folding into one K=32 dot via a VMEM
    # scratch would need per-core scratch zero-init under the parallel grid
    # for a marginal win, so it is intentionally skipped.
    h1 = (jnp.dot(x_s, w1s_ref[...], preferred_element_type=jnp.float32)
          + jnp.dot(x_a, w1a_ref[...], preferred_element_type=jnp.float32)
          + b1_ref[...])
    h1 = jnp.maximum(h1, 0.0)

    # Layer 2
    h2 = jnp.dot(h1, w2_ref[...], preferred_element_type=jnp.float32) + b2_ref[...]
    h2 = jnp.maximum(h2, 0.0)

    # Fused, lane-padded head: one MXU push for both mu and sigma.
    head = jnp.dot(h2, w3_ref[...], preferred_element_type=jnp.float32) + b3_ref[...]

    # Clamp only the sigma lanes [sd, 2sd). Bounds are row-invariant: build a
    # (1, head_pad) iota and broadcast the resulting lo/hi down the batch.
    n_out = head.shape[1]
    lane = jax.lax.broadcasted_iota(jnp.int32, (1, n_out), 1)
    is_sigma = (lane >= state_dim) & (lane < 2 * state_dim)
    lo = jnp.where(is_sigma, 1e-6, -jnp.inf).astype(jnp.float32)
    hi = jnp.where(is_sigma, 1e5, jnp.inf).astype(jnp.float32)
    out_ref[...] = jnp.clip(head, lo, hi).astype(out_ref.dtype)


def gaussian_model_forward(state, action, params, *, block_b=1024,
                           out_dtype=jnp.float32, return_packed=False):
    """state: [B, state_dim], action: [B, action_dim].

    Returns (mu, sigma), each [B, state_dim]; or, with return_packed=True, the
    lane-dense [B, head_pad] slab (lanes [0,sd)=mu, [sd,2sd)=clamped sigma) so
    the consumer can slice lazily instead of re-reading the slab here.
    """
    B, state_dim = state.shape
    action_dim = action.shape[1]
    h1 = params["w1s"].shape[1]
    h2 = params["w2"].shape[1]
    head_pad = params["w3"].shape[1]            # 2*state_dim rounded up to 128 lanes

    tb, b_pad = _choose_batch_tile(B, block_b)
    if b_pad != B:
        state = jnp.pad(state, ((0, b_pad - B), (0, 0)))
        action = jnp.pad(action, ((0, b_pad - B), (0, 0)))

    grid = (b_pad // tb,)

    in_dim = state_dim + action_dim
    out_itemsize = jnp.dtype(out_dtype).itemsize
    weight_bytes = sum(int(v.size) * v.dtype.itemsize for v in params.values())
    cost = pl.CostEstimate(
        flops=2 * b_pad * (in_dim * h1 + h1 * h2 + h2 * head_pad),
        transcendentals=0,
        bytes_accessed=int(b_pad * (state.dtype.itemsize * state_dim
                                    + action.dtype.itemsize * action_dim
                                    + out_itemsize * head_pad) + weight_bytes),
    )

    # VMEM budget: double-buffered input/output tiles (inputs pad to 128 lanes
    # in VMEM) + (double-buffered) resident weights + slack. Clamped to stay
    # inside v7x's 64 MiB physical while still raising v5e's 16 MiB default.
    in_row_bytes = 4 * (_round_up(state_dim, 128) + _round_up(action_dim, 128))
    out_row_bytes = out_itemsize * head_pad
    vmem_needed = 2 * tb * (in_row_bytes + out_row_bytes) + 2 * weight_bytes + (2 << 20)
    vmem_limit = int(min(max(vmem_needed, 32 << 20), 48 << 20))

    def row_spec(d):
        return pl.BlockSpec((tb, d), lambda i: (i, 0))

    def resident_spec(shape):
        # Constant block index -> DMA'd once, stays resident in VMEM across
        # steps. (pl.Buffered(1) would shave the ~40 KiB second buffer; left
        # default-buffered since the saving is negligible.)
        return pl.BlockSpec(shape, lambda i: (0, 0))

    out = pl.pallas_call(
        functools.partial(gaussian_model_kernel, state_dim=state_dim),
        out_shape=jax.ShapeDtypeStruct((b_pad, head_pad), out_dtype),
        grid=grid,
        in_specs=[
            row_spec(state_dim),
            row_spec(action_dim),
            resident_spec(params["w1s"].shape),
            resident_spec(params["w1a"].shape),
            resident_spec(params["b1"].shape),
            resident_spec(params["w2"].shape),
            resident_spec(params["b2"].shape),
            resident_spec(params["w3"].shape),
            resident_spec(params["b3"].shape),
        ],
        out_specs=pl.BlockSpec((tb, head_pad), lambda i: (i, 0)),
        compiler_params=pltpu.CompilerParams(
            dimension_semantics=("parallel",),
            vmem_limit_bytes=vmem_limit),
        cost_estimate=cost,
    )(state, action,
      params["w1s"], params["w1a"], params["b1"],
      params["w2"], params["b2"],
      params["w3"], params["b3"])

    if return_packed:
        return out[:B] if b_pad != B else out
    mu = out[:B, :state_dim]
    sigma = out[:B, state_dim:2 * state_dim]
    return mu, sigma


def init_params(key, state_dim, action_dim, hidden_size):
    """nn.Linear-style U(-1/sqrt(fan_in), 1/sqrt(fan_in)) init, then repack:
       W1 split into (state|action) rows; W3a/W3b fused + zero-padded to a
       128-lane multiple. Weights stay f32 (they are tiny and VMEM-resident)."""
    in_dim = state_dim + action_dim
    head_pad = _round_up(2 * state_dim, 128)
    dims = [("1", in_dim, hidden_size[0]),
            ("2", hidden_size[0], hidden_size[1]),
            ("3a", hidden_size[1], state_dim),
            ("3b", hidden_size[1], state_dim)]
    raw = {}
    keys = jax.random.split(key, 2 * len(dims))
    for i, (name, fan_in, fan_out) in enumerate(dims):
        bound = 1.0 / (fan_in ** 0.5)
        raw[f"w{name}"] = jax.random.uniform(
            keys[2 * i], (fan_in, fan_out), jnp.float32, -bound, bound)
        raw[f"b{name}"] = jax.random.uniform(
            keys[2 * i + 1], (1, fan_out), jnp.float32, -bound, bound)

    w3 = jnp.zeros((hidden_size[1], head_pad), jnp.float32)
    w3 = w3.at[:, :state_dim].set(raw["w3a"])
    w3 = w3.at[:, state_dim:2 * state_dim].set(raw["w3b"])
    b3 = jnp.zeros((1, head_pad), jnp.float32)
    b3 = b3.at[:, :state_dim].set(raw["b3a"])
    b3 = b3.at[:, state_dim:2 * state_dim].set(raw["b3b"])

    return {
        "w1s": raw["w1"][:state_dim],
        "w1a": raw["w1"][state_dim:],
        "b1": raw["b1"],
        "w2": raw["w2"],
        "b2": raw["b2"],
        "w3": w3,
        "b3": b3,
    }


def reference_forward(state, action, params):
    """Pure-JAX reference mirroring the PyTorch module."""
    sd = state.shape[1]
    w1 = jnp.concatenate([params["w1s"], params["w1a"]], axis=0)
    sa = jnp.concatenate([state.astype(jnp.float32), action.astype(jnp.float32)], axis=1)
    h = jax.nn.relu(sa @ w1 + params["b1"])
    h = jax.nn.relu(h @ params["w2"] + params["b2"])
    head = h @ params["w3"] + params["b3"]
    mu = head[:, :sd]
    sigma = jnp.clip(head[:, sd:2 * sd], 1e-6, 1e5)
    return mu, sigma


if __name__ == "__main__":
    key = jax.random.PRNGKey(0)
    k_params, k_state, k_action = jax.random.split(key, 3)

    batch = 8
    state_dim = 24
    action_dim = 8
    hidden_size = (32, 32)

    params = init_params(k_params, state_dim, action_dim, hidden_size)
    state = jax.random.normal(k_state, (batch, state_dim), jnp.float32)
    action = jax.random.normal(k_action, (batch, action_dim), jnp.float32)

    # f32 output path (exact module semantics).
    mu, sigma = jax.jit(gaussian_model_forward)(state, action, params)
    jax.block_until_ready((mu, sigma))

    mu_ref, sigma_ref = reference_forward(state, action, params)

    assert mu.shape == (batch, state_dim)
    assert sigma.shape == (batch, state_dim)
    assert bool(jnp.all(sigma >= 1e-6)) and bool(jnp.all(sigma <= 1e5))
    assert bool(jnp.allclose(mu, mu_ref, atol=1e-4, rtol=1e-4))
    assert bool(jnp.allclose(sigma, sigma_ref, atol=1e-4, rtol=1e-4))

    # bf16 output path (halves the dominant HBM writeback stream at large B);
    # loose tolerance against the f32 reference.
    mu_bf, sigma_bf = jax.jit(
        functools.partial(gaussian_model_forward, out_dtype=jnp.bfloat16)
    )(state, action, params)
    jax.block_until_ready((mu_bf, sigma_bf))
    assert bool(jnp.allclose(mu_bf.astype(jnp.float32), mu_ref, atol=3e-2, rtol=3e-2))
    assert bool(jnp.allclose(sigma_bf.astype(jnp.float32), sigma_ref, atol=3e-2, rtol=3e-2))

    # TODO(synk): `broadcast()` (Normal.rsample + obs-bounds clamp) is RNG glue
    # outside the hot forward path; not implemented in-kernel.
    # TODO(synk): MBPO normally runs an ensemble of these models; lane-packing
    # the ensemble (W1:[32, E*H1], block-diag W2/W3 or an extra grid axis) is
    # the only way to make this K<=32 kernel MXU-limited — follow-up outside
    # this single-model module's spec.
    print("KERNEL_OK")
</pallas_src>

<mosaic_0001>
module attributes {stable_mosaic.version = 11 : i64} {
  func.func @gaussian_model_kernel(%arg0: i32, %arg1: memref<8x24xf32, #tpu.memory_space<vmem>>, %arg2: memref<8x8xf32, #tpu.memory_space<vmem>>, %arg3: memref<24x32xf32, #tpu.memory_space<vmem>>, %arg4: memref<8x32xf32, #tpu.memory_space<vmem>>, %arg5: memref<1x32xf32, #tpu.memory_space<vmem>>, %arg6: memref<32x32xf32, #tpu.memory_space<vmem>>, %arg7: memref<1x32xf32, #tpu.memory_space<vmem>>, %arg8: memref<32x128xf32, #tpu.memory_space<vmem>>, %arg9: memref<1x128xf32, #tpu.memory_space<vmem>>, %arg10: memref<8x128xf32, #tpu.memory_space<vmem>>) attributes {dimension_semantics = [#tpu.dimension_semantics<parallel>], iteration_bounds = array<i64: 1>, scalar_prefetch = 0 : i64, scratch_operands = 0 : i64, tpu.core_type = #tpu.core_type<tc>, window_params = [{transform_indices = @transform_0, window_bounds = array<i64: 8, 24>}, {transform_indices = @transform_1, window_bounds = array<i64: 8, 8>}, {pipeline_mode = #tpu.pipeline_mode<synchronous>, transform_indices = @transform_2, window_bounds = array<i64: 24, 32>}, {pipeline_mode = #tpu.pipeline_mode<synchronous>, transform_indices = @transform_3, window_bounds = array<i64: 8, 32>}, {pipeline_mode = #tpu.pipeline_mode<synchronous>, transform_indices = @transform_4, window_bounds = array<i64: 1, 32>}, {pipeline_mode = #tpu.pipeline_mode<synchronous>, transform_indices = @transform_5, window_bounds = array<i64: 32, 32>}, {pipeline_mode = #tpu.pipeline_mode<synchronous>, transform_indices = @transform_6, window_bounds = array<i64: 1, 32>}, {pipeline_mode = #tpu.pipeline_mode<synchronous>, transform_indices = @transform_7, window_bounds = array<i64: 32, 128>}, {pipeline_mode = #tpu.pipeline_mode<synchronous>, transform_indices = @transform_8, window_bounds = array<i64: 1, 128>}, {transform_indices = @transform_9, window_bounds = array<i64: 8, 128>}]} {
    %c0 = arith.constant 0 : index
    %c0_0 = arith.constant 0 : index
    %0 = vector.load %arg1[%c0, %c0_0] : memref<8x24xf32, #tpu.memory_space<vmem>>, vector<8x24xf32>
    %c0_1 = arith.constant 0 : index
    %c0_2 = arith.constant 0 : index
    %1 = vector.load %arg2[%c0_1, %c0_2] : memref<8x8xf32, #tpu.memory_space<vmem>>, vector<8x8xf32>
    %c0_3 = arith.constant 0 : index
    %c0_4 = arith.constant 0 : index
    %2 = vector.load %arg3[%c0_3, %c0_4] : memref<24x32xf32, #tpu.memory_space<vmem>>, vector<24x32xf32>
    %cst = arith.constant dense<0.000000e+00> : vector<8x32xf32>
    %3 = tpu.matmul %0, %2, %cst {dimension_numbers = #tpu.dot_dimension_numbers<[1], [0], [0], [1], [0, 0, 1, 1], [], []>} : vector<8x24xf32>, vector<24x32xf32>, vector<8x32xf32> -> vector<8x32xf32>
    %c0_5 = arith.constant 0 : index
    %c0_6 = arith.constant 0 : index
    %4 = vector.load %arg4[%c0_5, %c0_6] : memref<8x32xf32, #tpu.memory_space<vmem>>, vector<8x32xf32>
    %cst_7 = arith.constant dense<0.000000e+00> : vector<8x32xf32>
    %5 = tpu.matmul %1, %4, %cst_7 {dimension_numbers = #tpu.dot_dimension_numbers<[1], [0], [0], [1], [0, 0, 1, 1], [], []>} : vector<8x8xf32>, vector<8x32xf32>, vector<8x32xf32> -> vector<8x32xf32>
    %6 = arith.addf %3, %5 : vector<8x32xf32>
    %c0_8 = arith.constant 0 : index
    %c0_9 = arith.constant 0 : index
    %7 = vector.load %arg5[%c0_8, %c0_9] : memref<1x32xf32, #tpu.memory_space<vmem>>, vector<1x32xf32>
    %8 = vector.broadcast %7 : vector<1x32xf32> to vector<8x32xf32>
    %9 = arith.addf %6, %8 : vector<8x32xf32>
    %cst_10 = arith.constant 0.000000e+00 : f32
    %10 = vector.broadcast %cst_10 : f32 to vector<8x32xf32>
    %11 = arith.maximumf %9, %10 : vector<8x32xf32>
    %c0_11 = arith.constant 0 : index
    %c0_12 = arith.constant 0 : index
    %12 = vector.load %arg6[%c0_11, %c0_12] : memref<32x32xf32, #tpu.memory_space<vmem>>, vector<32x32xf32>
    %cst_13 = arith.constant dense<0.000000e+00> : vector<8x32xf32>
    %13 = tpu.matmul %11, %12, %cst_13 {dimension_numbers = #tpu.dot_dimension_numbers<[1], [0], [0], [1], [0, 0, 1, 1], [], []>} : vector<8x32xf32>, vector<32x32xf32>, vector<8x32xf32> -> vector<8x32xf32>
    %c0_14 = arith.constant 0 : index
    %c0_15 = arith.constant 0 : index
    %14 = vector.load %arg7[%c0_14, %c0_15] : memref<1x32xf32, #tpu.memory_space<vmem>>, vector<1x32xf32>
    %15 = vector.broadcast %14 : vector<1x32xf32> to vector<8x32xf32>
    %16 = arith.addf %13, %15 : vector<8x32xf32>
    %cst_16 = arith.constant 0.000000e+00 : f32
    %17 = vector.broadcast %cst_16 : f32 to vector<8x32xf32>
    %18 = arith.maximumf %16, %17 : vector<8x32xf32>
    %c0_17 = arith.constant 0 : index
    %c0_18 = arith.constant 0 : index
    %19 = vector.load %arg8[%c0_17, %c0_18] : memref<32x128xf32, #tpu.memory_space<vmem>>, vector<32x128xf32>
    %cst_19 = arith.constant dense<0.000000e+00> : vector<8x128xf32>
    %20 = tpu.matmul %18, %19, %cst_19 {dimension_numbers = #tpu.dot_dimension_numbers<[1], [0], [0], [1], [0, 0, 1, 1], [], []>} : vector<8x32xf32>, vector<32x128xf32>, vector<8x128xf32> -> vector<8x128xf32>
    %c0_20 = arith.constant 0 : index
    %c0_21 = arith.constant 0 : index
    %21 = vector.load %arg9[%c0_20, %c0_21] : memref<1x128xf32, #tpu.memory_space<vmem>>, vector<1x128xf32>
    %22 = vector.broadcast %21 : vector<1x128xf32> to vector<8x128xf32>
    %23 = arith.addf %20, %22 : vector<8x128xf32>
    %24 = tpu.iota {dimensions = array<i32: 1>} : vector<1x128xi32>
    %c24_i32 = arith.constant 24 : i32
    %25 = vector.broadcast %c24_i32 : i32 to vector<1x128xi32>
    %26 = arith.cmpi sge, %24, %25 : vector<1x128xi32>
    %c48_i32 = arith.constant 48 : i32
    %27 = vector.broadcast %c48_i32 : i32 to vector<1x128xi32>
    %28 = arith.cmpi slt, %24, %27 : vector<1x128xi32>
    %29 = arith.andi %26, %28 : vector<1x128xi1>
    %cst_22 = arith.constant 9.99999997E-7 : f32
    %cst_23 = arith.constant 0xFF800000 : f32
    %30 = vector.broadcast %cst_22 : f32 to vector<1x128xf32>
    %31 = vector.broadcast %cst_23 : f32 to vector<1x128xf32>
    %32 = arith.select %29, %30, %31 : vector<1x128xi1>, vector<1x128xf32>
    %cst_24 = arith.constant 1.000000e+05 : f32
    %cst_25 = arith.constant 0x7F800000 : f32
    %33 = vector.broadcast %cst_24 : f32 to vector<1x128xf32>
    %34 = vector.broadcast %cst_25 : f32 to vector<1x128xf32>
    %35 = arith.select %29, %33, %34 : vector<1x128xi1>, vector<1x128xf32>
    %36 = vector.broadcast %32 : vector<1x128xf32> to vector<8x128xf32>
    %37 = arith.maximumf %36, %23 : vector<8x128xf32>
    %38 = vector.broadcast %35 : vector<1x128xf32> to vector<8x128xf32>
    %39 = arith.minimumf %38, %37 : vector<8x128xf32>
    %c0_26 = arith.constant 0 : index
    %c0_27 = arith.constant 0 : index
    %40 = vector.load %arg10[%c0_26, %c0_27] : memref<8x128xf32, #tpu.memory_space<vmem>>, vector<8x128xf32>
    tpu.vector_store %arg10[%c0_26, %c0_27], %39 {strides = array<i32>} : memref<8x128xf32, #tpu.memory_space<vmem>>, vector<8x128xf32>,
    return
  }
  func.func @transform_0(%arg0: i32) -> (i32, i32) {
    %c0_i32 = arith.constant 0 : i32
    %c0_i32_0 = arith.constant 0 : i32
    return %arg0, %c0_i32 : i32, i32
  }
  func.func @transform_1(%arg0: i32) -> (i32, i32) {
    %c0_i32 = arith.constant 0 : i32
    %c0_i32_0 = arith.constant 0 : i32
    return %arg0, %c0_i32 : i32, i32
  }
  func.func @transform_2(%arg0: i32) -> (i32, i32) {
    %c0_i32 = arith.constant 0 : i32
    %c0_i32_0 = arith.constant 0 : i32
    %c0_i32_1 = arith.constant 0 : i32
    return %c0_i32, %c0_i32_0 : i32, i32
  }
  func.func @transform_3(%arg0: i32) -> (i32, i32) {
    %c0_i32 = arith.constant 0 : i32
    %c0_i32_0 = arith.constant 0 : i32
    %c0_i32_1 = arith.constant 0 : i32
    return %c0_i32, %c0_i32_0 : i32, i32
  }
  func.func @transform_4(%arg0: i32) -> (i32, i32) {
    %c0_i32 = arith.constant 0 : i32
    %c0_i32_0 = arith.constant 0 : i32
    %c0_i32_1 = arith.constant 0 : i32
    return %c0_i32, %c0_i32_0 : i32, i32
  }
  func.func @transform_5(%arg0: i32) -> (i32, i32) {
    %c0_i32 = arith.constant 0 : i32
    %c0_i32_0 = arith.constant 0 : i32
    %c0_i32_1 = arith.constant 0 : i32
    return %c0_i32, %c0_i32_0 : i32, i32
  }
  func.func @transform_6(%arg0: i32) -> (i32, i32) {
    %c0_i32 = arith.constant 0 : i32
    %c0_i32_0 = arith.constant 0 : i32
    %c0_i32_1 = arith.constant 0 : i32
    return %c0_i32, %c0_i32_0 : i32, i32
  }
  func.func @transform_7(%arg0: i32) -> (i32, i32) {
    %c0_i32 = arith.constant 0 : i32
    %c0_i32_0 = arith.constant 0 : i32
    %c0_i32_1 = arith.constant 0 : i32
    return %c0_i32, %c0_i32_0 : i32, i32
  }
  func.func @transform_8(%arg0: i32) -> (i32, i32) {
    %c0_i32 = arith.constant 0 : i32
    %c0_i32_0 = arith.constant 0 : i32
    %c0_i32_1 = arith.constant 0 : i32
    return %c0_i32, %c0_i32_0 : i32, i32
  }
  func.func @transform_9(%arg0: i32) -> (i32, i32) {
    %c0_i32 = arith.constant 0 : i32
    %c0_i32_0 = arith.constant 0 : i32
    return %arg0, %c0_i32 : i32, i32
  }
}

</mosaic_0001>

<bundles_post_ra>
// kernel: gaussian_model_forward.1
= control target key start
LH: loop header
LB: loop body
LE: loop exit
PB: predicated region body
PF: predicated region fallthrough
CT: control target
= control target key end

     0   :  { %14 = vsyncpa [#allocation3], 0  ;;  %s798_s0 = inlined_call_operand.hbm [shape: f32[8,24], index: 0, kind: input, shape index: {}]   ;;  %s799_s1 = inlined_call_operand.hbm [shape: f32[8,8], index: 1, kind: input, shape index: {}]   ;;  %s800_s2 = inlined_call_operand.hbm [shape: f32[24,32], index: 2, kind: input, shape index: {}]   ;;  %s801_s3 = inlined_call_operand.vmem [shape: f32[8,32], index: 3, kind: input, shape index: {}]   ;;  %s802_s4 = inlined_call_operand.vmem [shape: f32[1,32], index: 4, kind: input, shape index: {}]   ;;  %s803_s5 = inlined_call_operand.hbm [shape: f32[32,32], index: 5, kind: input, shape index: {}]   ;;  %s804_s6 = inlined_call_operand.vmem [shape: f32[1,32], index: 6, kind: input, shape index: {}]   ;;  %s805_s7 = inlined_call_operand.hbm [shape: f32[32,128], index: 7, kind: input, shape index: {}]   ;;  %s806_s8 = inlined_call_operand.vmem [shape: f32[1,128], index: 8, kind: input, shape index: {}]   ;;  %s807_s9 = inlined_call_operand.vmem [shape: f32[8,128], index: 9, kind: output, shape index: {}]  }
   0x1   :  { %15 = vsyncpa [#allocation5], 0 }
   0x2   :  { %16 = vsyncpa [#allocation8], 0  ;;  %s648_s30 = smov [#allocation4]   ;;  %s532_s13 = scalar_lea.hbm %s799_s1, 128 }
   0x3   :  { %s33_s10 = sshll.u32 %s648_s30, 4  ;;  %p533_p0 = scmp.ne.s32.totalorder %s799_s1, %s532_s13  ;;  %s34_s10 = int_to_ptr.vmem [resolvable:$true] %s33_s10 }
   0x4   :  { %p536_p1 = scmp.lt.u32.totalorder %s532_s13, %s799_s1 }
   0x6   :  { %p538_p2 = pnand %p536_p1, %p533_p0 }
   0x8   :  { %541 = shalt.err (!%p538_p2)
}
   0x9   :  { %s542_s18 = scalar_lea.vmem %s34_s10, 128  ;;  %p547_p4 = scmp.lt.s32.totalorder %s34_s10, %s34_s10 }
   0xa   :  { %p543_p3 = scmp.ne.s32.totalorder %s34_s10, %s542_s18  ;;  %p548_p5 = scmp.lt.s32.totalorder %s542_s18, %s542_s18 }
   0xc   :  { %p549_p6 = por %p548_p5, %p547_p4 }
   0xe   :  { %p550_p7 = pnand %p549_p6, %p543_p3 }
  0x10   :  { %553 = shalt.err (!%p550_p7)
}
  0x11   :  { %36 = dma.hbm_to_vmem [thread:$0]  %s799_s1, 128, %s34_s10, [#allocation5]  }
  0x12   :  { %s649_s21 = smov [#allocation7]   ;;  %s650_s23 = smov [#allocation2]  }
  0x13   :  { %s58_s22 = sshll.u32 %s649_s21, 4  ;;  %s23_s24 = sshll.u32 %s650_s23, 4  ;;  %s59_s22 = int_to_ptr.vmem [resolvable:$true] %s58_s22  ;;  %s24_s24 = int_to_ptr.vmem [resolvable:$true] %s23_s24 }
  0x14   :  { %s554_s27 = scalar_lea.hbm %s803_s5, 512 }
  0x15   :  { %p555_p8 = scmp.ne.s32.totalorder %s803_s5, %s554_s27  ;;  %p558_p9 = scmp.lt.u32.totalorder %s554_s27, %s803_s5 }
  0x17   :  { %p560_p10 = pnand %p558_p9, %p555_p8 }
  0x19   :  { %563 = shalt.err (!%p560_p10)
}
  0x1a   :  { %s564_s1 = scalar_lea.vmem %s59_s22, 512  ;;  %p569_p12 = scmp.lt.s32.totalorder %s59_s22, %s59_s22 }
  0x1b   :  { %p565_p11 = scmp.ne.s32.totalorder %s59_s22, %s564_s1  ;;  %p570_p13 = scmp.lt.s32.totalorder %s564_s1, %s564_s1 }
  0x1d   :  { %p571_p0 = por %p570_p13, %p569_p12 }
  0x1f   :  { %p572_p1 = pnand %p571_p0, %p565_p11 }
  0x21   :  { %575 = shalt.err (!%p572_p1)
}
  0x22   :  { %s651_s10 = smov 128   ;;  %s652_s12 = smov 8  }
  0x23   :  { %64 = dma.hbm_to_vmem [thread:$0]  %s803_s5, 512, %s59_s22, [#allocation8], %s651_s10, %s651_s10, %s652_s12  }
  0x24   :  { %s576_s17 = scalar_lea.hbm %s798_s0, 128 }
  0x25   :  { %p577_p2 = scmp.ne.s32.totalorder %s798_s0, %s576_s17  ;;  %p580_p3 = scmp.lt.u32.totalorder %s576_s17, %s798_s0 }
  0x27   :  { %p582_p4 = pnand %p580_p3, %p577_p2 }
  0x29   :  { %585 = shalt.err (!%p582_p4)
}
  0x2a   :  { %s586_s23 = scalar_lea.vmem %s24_s24, 128  ;;  %p591_p6 = scmp.lt.s32.totalorder %s24_s24, %s24_s24 }
  0x2b   :  { %p587_p5 = scmp.ne.s32.totalorder %s24_s24, %s586_s23  ;;  %p592_p7 = scmp.lt.s32.totalorder %s586_s23, %s586_s23 }
  0x2d   :  { %p593_p8 = por %p592_p7, %p591_p6 }
  0x2f   :  { %p594_p9 = pnand %p593_p8, %p587_p5 }
  0x31   :  { %597 = shalt.err (!%p594_p9)
}
  0x32   :  { %26 = dma.hbm_to_vmem [thread:$0]  %s798_s0, 128, %s24_s24, [#allocation3]  }
  0x33   :  { %s653_s25 = smov [#allocation6]   ;;  %s654_s27 = smov [#allocation9]  }
  0x34   :  { %s42_s26 = sshll.u32 %s653_s25, 4  ;;  %s72_s28 = sshll.u32 %s654_s27, 4  ;;  %s43_s26 = int_to_ptr.vmem [resolvable:$true] %s42_s26  ;;  %s73_s28 = int_to_ptr.vmem [resolvable:$true] %s72_s28 }
  0x35   :  { %s598_s11 = scalar_lea.hbm %s800_s2, 384 }
  0x36   :  { %p599_p10 = scmp.ne.s32.totalorder %s800_s2, %s598_s11  ;;  %p602_p11 = scmp.lt.u32.totalorder %s598_s11, %s800_s2 }
  0x38   :  { %p604_p12 = pnand %p602_p11, %p599_p10 }
  0x3a   :  { %607 = shalt.err (!%p604_p12)
}
  0x3b   :  { %s608_s0 = scalar_lea.vmem %s43_s26, 384  ;;  %p613_p0 = scmp.lt.s32.totalorder %s43_s26, %s43_s26 }
  0x3c   :  { %p609_p13 = scmp.ne.s32.totalorder %s43_s26, %s608_s0  ;;  %p614_p1 = scmp.lt.s32.totalorder %s608_s0, %s608_s0 }
  0x3e   :  { %p615_p2 = por %p614_p1, %p613_p0 }
  0x40   :  { %p616_p3 = pnand %p615_p2, %p609_p13 }
  0x42   :  { %619 = shalt.err (!%p616_p3)
}
  0x43   :  { %48 = dma.hbm_to_vmem [thread:$0]  %s800_s2, 384, %s43_s26, [#allocation5], %s651_s10, %s651_s10, %s652_s12  }
  0x44   :  { %s620_s19 = scalar_lea.hbm %s805_s7, 512 }
  0x45   :  { %p621_p4 = scmp.ne.s32.totalorder %s805_s7, %s620_s19  ;;  %p624_p5 = scmp.lt.u32.totalorder %s620_s19, %s805_s7 }
  0x47   :  { %p626_p6 = pnand %p624_p5, %p621_p4 }
  0x49   :  { %629 = shalt.err (!%p626_p6)
}
  0x4a   :  { %s630_s22 = scalar_lea.vmem %s73_s28, 512  ;;  %p635_p8 = scmp.lt.s32.totalorder %s73_s28, %s73_s28 }
  0x4b   :  { %p631_p7 = scmp.ne.s32.totalorder %s73_s28, %s630_s22  ;;  %p636_p9 = scmp.lt.s32.totalorder %s630_s22, %s630_s22 }
  0x4d   :  { %p637_p10 = por %p636_p9, %p635_p8 }
  0x4f   :  { %p638_p11 = pnand %p637_p10, %p631_p7 }
  0x51   :  { %641 = shalt.err (!%p638_p11)
}
  0x52   :  { %78 = dma.hbm_to_vmem [thread:$0]  %s805_s7, 512, %s73_s28, [#allocation8], %s651_s10, %s651_s10, %s652_s12  }
  0x53   :  { %642 = dma.done.wait [#allocation3], 128  }
  0x54   :  { %643 = vsyncadd [#allocation3], 4294967168 }
  0x55   :  { %644 = dma.done.wait [#allocation5], 512  }
  0x56   :  { %645 = vsyncadd [#allocation5], 4294966784 }
  0x57   :  { %646 = dma.done.wait [#allocation8], 1024  }
  0x58   :  { %647 = vsyncadd [#allocation8], 4294966272  ;;  %v655_v0 = vmov 0.0|0.0   ;;  %v656_v1 = vmov 0.0   ;;  %vm657_vm0 = vmmov 0   ;;  %vm102_vm1 = vcmask 64512  }
  0x59   :  { %505 = vmatprep.subr.bf16.mxu1 %v655_v0  ;;  %469 = vmatprep.subr.mxu0 %v656_v1  ;;  %v98_v2 = vld [vmem:[#allocation6] sm:$0xff]  ;;  %v99_v3 = vld [vmem:[#allocation6 + $0x8] sm:$0xff]  ;;  %v101_v4 = vld [vmem:[%s801_s3] sm:$0xff]  ;;  %vm176_vm2 = vcmask 195584   ;;  %vm270_vm3 = vcmask 261120   ;;  %v429_v34 = vlaneseq  ;;  %v658_v38 = vmov -inf  }
  0x5a   :  { %471 = vmatprep.mubr.msk.f32.mxu0 %vm657_vm0, %v656_v1  ;;  %480 = vmatprep.mubr.msk.f32.mxu1 %vm657_vm0, %v656_v1  ;;  %v506_v5 = vpack.c.bf16 %v99_v3, %v98_v2  ;;  %v97_v6 = vld [vmem:[#allocation4] sm:$0xff]  ;;  %v100_v7 = vld [vmem:[#allocation6 + $0x10] sm:$0xff]  ;;  %v260_v10 = vld [vmem:[#allocation7 + $0x8] sm:$0xff]  ;;  %v659_v42 = vmov inf  }
  0x5b   :  { %470 = vmatpush3.msra.mxu0 %v101_v4  ;;  %v96_v8 = vld [vmem:[#allocation2] sm:$0xff]  ;;  %v259_v9 = vld [vmem:[#allocation7] sm:$0xff]  ;;  %v261_v12 = vld [vmem:[#allocation7 + $0x10] sm:$0xff]  ;;  %v430_v35 = vand.u32 127, %v429_v34 }
  0x5c   :  { %472 = vmatmul.mubr.msk.f32.vlgmr.msra.gmra.mrb[0].mxu0 %vm102_vm1, %v97_v6  ;;  %508 = vmatprep.subr.bf16.mxu0 %v655_v0  ;;  %v509_v11 = vpack.c.bf16 %v260_v10, %v259_v9  ;;  %v262_v13 = vld [vmem:[#allocation7 + $0x18] sm:$0xff]  ;;  %v345_v15 = vld [vmem:[#allocation9] sm:$0xff]  ;;  %v346_v16 = vld [vmem:[#allocation9 + $0x8] sm:$0xff] }
  0x5d   :  { %507 = vmatpush3.bf16.msra.mxu1 %v506_v5  ;;  %491 = vmatprep.mubr.msk.f32.mxu0 %vm657_vm0, %v656_v1  ;;  %v512_v14 = vpack.c.bf16 %v262_v13, %v261_v12  ;;  %v515_v17 = vpack.c.bf16 %v346_v16, %v345_v15  ;;  %v448_v21 = vld [vmem:[%s802_s4] ss:$0 sm:$0xff]  ;;  %v347_v26 = vld [vmem:[#allocation9 + $0x10] sm:$0xff]  ;;  %vm431_vm4 = vcmp.ge.s32.totalorder %v430_v35, 24  ;;  %vm432_vm5 = vcmp.lt.s32.totalorder %v430_v35, 48 }
  0x5e   :  { %478 = vmatprep.subr.mxu1 %v656_v1  ;;  %510 = vmatpush3.bf16.msra.mxu0 %v509_v11  ;;  %v348_v27 = vld [vmem:[#allocation9 + $0x18] sm:$0xff]  ;;  %vm433_vm6 = vmand %vm431_vm4, %vm432_vm5 }
  0x5f   :  { %511 = vmatprep.subr.bf16.mxu0 %v655_v0  ;;  %v518_v28 = vpack.c.bf16 %v348_v27, %v347_v26  ;;  %v449_v29 = vld [vmem:[%s804_s6] ss:$0 sm:$0xff]  ;;  %v434_v39 = vsel %vm433_vm6, 1e-06, %v658_v38  ;;  %v435_v43 = vsel %vm433_vm6, 100000.0, %v659_v42 }
  0x60   :  { %v451_v36 = vld [vmem:[%s806_s8] ss:$0 sm:$0xff] }
  0x61   :  { %479 = vmatpush3.msra.mxu1 %v100_v7 }
  0x62   :  { %481 = vmatmul.mubr.msk.f32.vlgmr.msra.gmra.mrb[0].mxu1 %vm176_vm2, %v96_v8  ;;  %514 = vmatprep.subr.bf16.mxu1 %v655_v0 }
  0x63   :  { %502 = vmatprep.mubr.msk.f32.mxu1 %vm657_vm0, %v656_v1  ;;  %513 = vmatpush3.bf16.msra.mxu0 %v512_v14 }
  0x64   :  { %516 = vmatpush3.bf16.msra.mxu1 %v515_v17 }
  0x65   :  { %517 = vmatprep.subr.bf16.mxu1 %v655_v0 }
  0x68   :  { %519 = vmatpush3.bf16.msra.mxu1 %v518_v28 }
 0x12f   :  { %v172_v18 = vpop.f32.mrb[0].mxu0 }
 0x130   :  { %v473_v19 = vpop.f32.mrb[1].mxu0 }
 0x135   :  { %v246_v20 = vpop.f32.mrb[0].mxu1 }
 0x136   :  { %v247_v22 = vadd.f32 %v246_v20, %v172_v18  ;;  %v482_v23 = vpop.f32.mrb[1].mxu1 }
 0x138   :  { %v257_v24 = vadd.f32 %v448_v21, %v247_v22 }
 0x13a   :  { %v258_v25 = vmax.f32 %v257_v24, 0.0 }
 0x13c   :  { %492 = vmatmul.mubr.msk.f32.vlgmr.msra.gmra.mrb[2].mxu0 %vm270_vm3, %v258_v25 }
 0x20f   :  { %v340_v30 = vpop.f32.mrb[2].mxu0 }
 0x210   :  { %v341_v31 = vadd.f32 %v449_v29, %v340_v30  ;;  %v493_v32 = vpop.f32.mrb[3].mxu0 }
 0x212   :  { %v344_v33 = vmax.f32 %v341_v31, 0.0 }
 0x214   :  { %503 = vmatmul.mubr.msk.f32.vlgmr.msra.gmra.mrb[2].mxu1 %vm270_vm3, %v344_v33 }
 0x2e7   :  { %v425_v37 = vpop.f32.mrb[2].mxu1 }
 0x2e8   :  { %v426_v40 = vadd.f32 %v451_v36, %v425_v37  ;;  %v504_v41 = vpop.f32.mrb[3].mxu1 }
 0x2ea   :  { %v436_v44 = vmax.f32 %v434_v39, %v426_v40 }
 0x2ec   :  { %v437_v45 = vmin.f32 %v435_v43, %v436_v44 }
 0x2ee   :  { %438 = vst [vmem:[%s807_s9] sm:$0xff] %v437_v45 }
 0x2ef   :  { %443 = vsyncpa [#allocation3], 1 }
 0x2f0   :  { %444 = vsyncpa [#allocation5], 1 }
 0x2f1   :  { %445 = vsyncpa [#allocation8], 1 }

</bundles_post_ra>
